<compile_context>
chip_gen: v7x
topology: tpu7x:2x2x1
jax: 0.10.0
libtpu: 0.0.40
codegen_flags: <defaults>
</compile_context>

<pallas_src>
import jax
import jax.numpy as jnp
from jax.experimental import pallas as pl
from jax.experimental.pallas import tpu as pltpu


def _round_up(x, m):
    return (x + m - 1) // m * m


# ---------------------------------------------------------------------------
# Kernels
# ---------------------------------------------------------------------------
def _mm_bias_relu_fullk_kernel(a_ref, w_ref, b_ref, o_ref):
    """Full-depth (TM,K)bf16 @ (K,TN)bf16 dot, fused bias + ReLU, f32 out.

    No accumulator scratch and no pl.when phases: the whole K reduction is a
    single MXU dot per grid point.
    """
    acc = jnp.dot(a_ref[...], w_ref[...], preferred_element_type=jnp.float32)
    o_ref[...] = jnp.maximum(acc + b_ref[...], 0.0).astype(o_ref.dtype)


def _mm_bias_relu_acc_kernel(a_ref, w_ref, b_ref, o_ref, acc_ref):
    """Large-K fallback: K-tiled grid with f32 VMEM accumulator."""
    k = pl.program_id(2)

    @pl.when(k == 0)
    def _():
        acc_ref[...] = jnp.zeros_like(acc_ref)

    acc_ref[...] += jnp.dot(a_ref[...], w_ref[...],
                            preferred_element_type=jnp.float32)

    @pl.when(k == pl.num_programs(2) - 1)
    def _():
        o_ref[...] = jnp.maximum(acc_ref[...] + b_ref[...],
                                 0.0).astype(o_ref.dtype)


# ---------------------------------------------------------------------------
# Wrapper: ReLU(Conv2d(x)) == BasicConv2d.forward
# ---------------------------------------------------------------------------
def basic_conv2d(x, weight, bias, *, stride=1, padding=1,
                 tm=256, tk=512, max_fullk=6144):
    """x: (N,C,H,W) f32 NCHW; weight: (OC,C,kh,kw); bias: (OC,). Returns NCHW."""
    N, C, H, W = x.shape
    out_c, _, kh, kw = weight.shape
    H_out = (H + 2 * padding - kh) // stride + 1
    W_out = (W + 2 * padding - kw) // stride + 1

    # ---- early bf16 casts: everything built below is half the bytes ---------
    x_bf = x.astype(jnp.bfloat16)
    w_bf = weight.astype(jnp.bfloat16)

    # ---- im2col straight into (M, K) layout from an NHWC view ---------------
    x_nhwc = jnp.transpose(x_bf, (0, 2, 3, 1))                   # (N, H, W, C)
    xp = jnp.pad(x_nhwc,
                 ((0, 0), (padding, padding), (padding, padding), (0, 0)))
    cols = [xp[:, i:i + stride * H_out:stride, j:j + stride * W_out:stride, :]
            for i in range(kh) for j in range(kw)]
    patches = jnp.concatenate(cols, axis=-1)                     # (N,Ho,Wo,kh*kw*C)
    K = kh * kw * C
    M = N * H_out * W_out
    patches = patches.reshape(M, K)

    # Weight -> (K, OC) with K ordered (kh, kw, C) to match the patches.
    w_mat = jnp.transpose(w_bf, (2, 3, 1, 0)).reshape(K, out_c)

    # ---- tile sizes ----------------------------------------------------------
    oc128 = _round_up(out_c, 128)
    tn = min(512, oc128)                 # primary lever: wide, lane-dense OC tile
    OC_pad = _round_up(out_c, tn)
    M_pad = _round_up(M, tm)
    K_pad = _round_up(K, 128)
    # TODO(synk): small-K early layers (e.g. C=3/4) still pay padding up to 128;
    # a direct-conv path would avoid that entirely.
    use_fullk = K_pad <= max_fullk       # every GoogLeNet layer takes this path
    if not use_fullk:
        K_pad = _round_up(K, tk)

    patches = jnp.pad(patches, ((0, M_pad - M), (0, K_pad - K)))
    w_mat = jnp.pad(w_mat, ((0, K_pad - K), (0, OC_pad - out_c)))
    b_mat = jnp.pad(bias.astype(jnp.float32),
                    (0, OC_pad - out_c)).reshape(1, OC_pad)

    m_tiles = M_pad // tm
    oc_tiles = OC_pad // tn

    # bytes_accessed reflects actual re-read factors (advisory for XLA sched).
    if use_fullk:
        patches_reads, weight_reads = 1, m_tiles       # patches resident over j
    else:
        patches_reads, weight_reads = oc_tiles, m_tiles
    cost = pl.CostEstimate(
        flops=2 * M_pad * K_pad * OC_pad,
        transcendentals=0,
        bytes_accessed=(patches.size * 2 * patches_reads
                        + w_mat.size * 2 * weight_reads
                        + b_mat.size * 4 * m_tiles
                        + M_pad * OC_pad * 4),
    )

    vmem_cap = 48 * 1024 * 1024   # safe on v5e/v6e (128 MiB) and v7x (64 MiB)

    if use_fullk:
        # 2-D grid: (M tiles, OC tiles).  OC (j) is the fast axis, so the
        # patches block index (i, 0) is unchanged across the OC sweep and is
        # DMA'd from HBM exactly once.
        out_flat = pl.pallas_call(
            _mm_bias_relu_fullk_kernel,
            out_shape=jax.ShapeDtypeStruct((M_pad, OC_pad), jnp.float32),
            grid_spec=pltpu.PrefetchScalarGridSpec(
                num_scalar_prefetch=0,
                grid=(m_tiles, oc_tiles),
                in_specs=[
                    pl.BlockSpec((tm, K_pad), lambda i, j: (i, 0)),   # patches
                    pl.BlockSpec((K_pad, tn), lambda i, j: (0, j)),   # weights
                    pl.BlockSpec((1, tn), lambda i, j: (0, j)),       # bias
                ],
                out_specs=pl.BlockSpec((tm, tn), lambda i, j: (i, j)),
            ),
            compiler_params=pltpu.CompilerParams(
                dimension_semantics=("parallel", "parallel"),
                vmem_limit_bytes=vmem_cap,
            ),
            cost_estimate=cost,
        )(patches, w_mat, b_mat)
    else:
        # Fallback for very large K: 3-D grid, K last ("arbitrary"), tk=512.
        out_flat = pl.pallas_call(
            _mm_bias_relu_acc_kernel,
            out_shape=jax.ShapeDtypeStruct((M_pad, OC_pad), jnp.float32),
            grid_spec=pltpu.PrefetchScalarGridSpec(
                num_scalar_prefetch=0,
                grid=(m_tiles, oc_tiles, K_pad // tk),
                in_specs=[
                    pl.BlockSpec((tm, tk), lambda i, j, k: (i, k)),
                    pl.BlockSpec((tk, tn), lambda i, j, k: (k, j)),
                    pl.BlockSpec((1, tn), lambda i, j, k: (0, j)),
                ],
                out_specs=pl.BlockSpec((tm, tn), lambda i, j, k: (i, j)),
                scratch_shapes=[pltpu.VMEM((tm, tn), jnp.float32)],
            ),
            compiler_params=pltpu.CompilerParams(
                dimension_semantics=("parallel", "parallel", "arbitrary"),
                vmem_limit_bytes=vmem_cap,
            ),
            cost_estimate=cost,
        )(patches, w_mat, b_mat)

    # Strip padding, back to NCHW to match the PyTorch module's output layout.
    out = out_flat[:M, :out_c].reshape(N, H_out, W_out, out_c)
    return jnp.transpose(out, (0, 3, 1, 2))


if __name__ == "__main__":
    key = jax.random.PRNGKey(0)
    k_x, k_w, k_b = jax.random.split(key, 3)

    # Small shapes consistent with the module: N=2, in_c=4, out_c=8, 16x16
    # spatial, GoogLeNet-style conv: kernel_size=3, stride=1, padding=1.
    N, in_c, out_c, H, W = 2, 4, 8, 16, 16
    kh = kw = 3

    x = jax.random.normal(k_x, (N, in_c, H, W), dtype=jnp.float32)
    fan_in = in_c * kh * kw
    weight = jax.random.normal(
        k_w, (out_c, in_c, kh, kw), dtype=jnp.float32) / jnp.sqrt(fan_in)
    bias = jax.random.normal(k_b, (out_c,), dtype=jnp.float32) * 0.1

    out = jax.jit(basic_conv2d)(x, weight, bias)
    out = jax.block_until_ready(out)

    # Cross-check against XLA's conv + ReLU on the same bf16-quantized inputs
    # the kernel feeds to the MXU (f32 accumulation on both sides).
    x_q = x.astype(jnp.bfloat16).astype(jnp.float32)
    w_q = weight.astype(jnp.bfloat16).astype(jnp.float32)
    ref = jax.lax.conv_general_dilated(
        x_q, w_q, window_strides=(1, 1), padding=((1, 1), (1, 1)),
        dimension_numbers=("NCHW", "OIHW", "NCHW"),
        precision=jax.lax.Precision.HIGHEST)
    ref = jnp.maximum(ref + bias.reshape(1, out_c, 1, 1), 0.0)

    assert out.shape == (N, out_c, H, W)
    assert jnp.allclose(out, ref, atol=2e-3, rtol=2e-3), \
        float(jnp.max(jnp.abs(out - ref)))

    print("KERNEL_OK")
</pallas_src>

<mosaic_0001>
module attributes {stable_mosaic.version = 11 : i64} {
  func.func @_mm_bias_relu_fullk_kernel(%arg0: i32, %arg1: i32, %arg2: memref<256x128xbf16, #tpu.memory_space<vmem>>, %arg3: memref<128x128xbf16, #tpu.memory_space<vmem>>, %arg4: memref<1x128xf32, #tpu.memory_space<vmem>>, %arg5: memref<256x128xf32, #tpu.memory_space<vmem>>) attributes {dimension_semantics = [#tpu.dimension_semantics<parallel>, #tpu.dimension_semantics<parallel>], iteration_bounds = array<i64: 2, 1>, scalar_prefetch = 0 : i64, scratch_operands = 0 : i64, tpu.core_type = #tpu.core_type<tc>, window_params = [{transform_indices = @transform_0, window_bounds = array<i64: 256, 128>}, {transform_indices = @transform_1, window_bounds = array<i64: 128, 128>}, {transform_indices = @transform_2, window_bounds = array<i64: 1, 128>}, {transform_indices = @transform_3, window_bounds = array<i64: 256, 128>}]} {
    %c0 = arith.constant 0 : index
    %c0_0 = arith.constant 0 : index
    %0 = vector.load %arg2[%c0, %c0_0] : memref<256x128xbf16, #tpu.memory_space<vmem>>, vector<256x128xbf16>
    %c0_1 = arith.constant 0 : index
    %c0_2 = arith.constant 0 : index
    %1 = vector.load %arg3[%c0_1, %c0_2] : memref<128x128xbf16, #tpu.memory_space<vmem>>, vector<128x128xbf16>
    %cst = arith.constant dense<0.000000e+00> : vector<256x128xf32>
    %2 = tpu.matmul %0, %1, %cst {dimension_numbers = #tpu.dot_dimension_numbers<[1], [0], [0], [1], [0, 0, 1, 1], [], []>} : vector<256x128xbf16>, vector<128x128xbf16>, vector<256x128xf32> -> vector<256x128xf32>
    %c0_3 = arith.constant 0 : index
    %c0_4 = arith.constant 0 : index
    %3 = vector.load %arg4[%c0_3, %c0_4] : memref<1x128xf32, #tpu.memory_space<vmem>>, vector<1x128xf32>
    %4 = vector.broadcast %3 : vector<1x128xf32> to vector<256x128xf32>
    %5 = arith.addf %2, %4 : vector<256x128xf32>
    %cst_5 = arith.constant 0.000000e+00 : f32
    %6 = vector.broadcast %cst_5 : f32 to vector<256x128xf32>
    %7 = arith.maximumf %5, %6 : vector<256x128xf32>
    %c0_6 = arith.constant 0 : index
    %c0_7 = arith.constant 0 : index
    %8 = vector.load %arg5[%c0_6, %c0_7] : memref<256x128xf32, #tpu.memory_space<vmem>>, vector<256x128xf32>
    tpu.vector_store %arg5[%c0_6, %c0_7], %7 {strides = array<i32>} : memref<256x128xf32, #tpu.memory_space<vmem>>, vector<256x128xf32>,
    return
  }
  func.func @transform_0(%arg0: i32, %arg1: i32) -> (i32, i32) {
    %c0_i32 = arith.constant 0 : i32
    %c0_i32_0 = arith.constant 0 : i32
    return %arg0, %c0_i32 : i32, i32
  }
  func.func @transform_1(%arg0: i32, %arg1: i32) -> (i32, i32) {
    %c0_i32 = arith.constant 0 : i32
    %c0_i32_0 = arith.constant 0 : i32
    return %c0_i32, %arg1 : i32, i32
  }
  func.func @transform_2(%arg0: i32, %arg1: i32) -> (i32, i32) {
    %c0_i32 = arith.constant 0 : i32
    %c0_i32_0 = arith.constant 0 : i32
    return %c0_i32, %arg1 : i32, i32
  }
  func.func @transform_3(%arg0: i32, %arg1: i32) -> (i32, i32) {
    %c0_i32 = arith.constant 0 : i32
    return %arg0, %arg1 : i32, i32
  }
}

</mosaic_0001>

<bundles_post_ra>
// kernel: basic_conv2d.1
= control target key start
LH: loop header
LB: loop body
LE: loop exit
PB: predicated region body
PF: predicated region fallthrough
CT: control target
= control target key end

     0   :  { %s970_s12 = smov 0   ;;  %s972_s13 = smov 0   ;;  %s1120_s0 = inlined_call_operand.vmem [shape: bf16[512,128], index: 0, kind: input, shape index: {}]   ;;  %s1121_s1 = inlined_call_operand.vmem [shape: bf16[128,128], index: 1, kind: input, shape index: {}]   ;;  %s1122_s2 = inlined_call_operand.vmem [shape: f32[1,128], index: 2, kind: input, shape index: {}]   ;;  %s1123_s3 = inlined_call_operand.vmem [shape: f32[512,128], index: 3, kind: output, shape index: {}]  }
   0x1   :  { %s974_s14 = smov 0  }
   0x2 LB: > { %s25_s15 = sadd.s32 1, %s944_s13  ;;  %p758_p0 = scmp.ge.s32.totalorder %s948_s14, 1  ;;  %s948_s14 = sphi %s974_s14, %s13_s14   ;;  %s944_s13 = sphi %s972_s13, %s1125_s13   ;;  %s940_s12 = sphi %s970_s12, %s1124_s12  }
   0x3   : > { %p27_p1 = scmp.ge.s32.totalorder %s25_s15, 2  ;;  %p169_p2 = scmp.lt.s32.totalorder %s948_s14, 3 }
   0x5   : > { %s1127_s15 = smov (%p27_p1, %s25_s15), 0  ;;  %p170_p3 = pnand %p758_p0, %p169_p2 }
   0x6   : > { %v902_v0 = vld [vmem:[%s1121_s1] sm:$0xff] (!%p170_p3)   ;;  %s759_s18 = sshll.u32 (!%p170_p3), %s940_s12, 5  ;;  %v903_v1 = vld [vmem:[%s1121_s1 + $0x8] sm:$0xff] (!%p170_p3)   ;;  %v904_v2 = vld [vmem:[%s1121_s1 + $0x10] sm:$0xff] (!%p170_p3)  }
   0x7   : > { %173 = sbr.rel (%p170_p3) target bundleno = 283 (0x11b), region = 32  ;;  %p204_p4 = scmp.lt.s32.totalorder (!%p170_p3), %s759_s18, 63  ;;  %814 = vmatprep.subr.bf16.mxu0 (!%p170_p3), %v902_v0  ;;  %862 = vmatprep.subr.bf16.mxu1 (!%p170_p3), %v902_v0  ;;  %v905_v3 = vld [vmem:[%s1121_s1 + $0x18] sm:$0xff] (!%p170_p3)   ;;  %v906_v6 = vld [vmem:[%s1121_s1 + $0x20] sm:$0xff] (!%p170_p3)   ;;  %v907_v7 = vld [vmem:[%s1121_s1 + $0x28] sm:$0xff] (!%p170_p3)  }
   0x8   : > { %815 = vmatpush3.bf16.msra.mxu0 (!%p170_p3), %v902_v0  ;;  %870 = vmatpush3.bf16.msra.mxu1 (!%p170_p3), %v902_v0  ;;  %v908_v8 = vld [vmem:[%s1121_s1 + $0x30] sm:$0xff] (!%p170_p3)   ;;  %v909_v9 = vld [vmem:[%s1121_s1 + $0x38] sm:$0xff] (!%p170_p3)   ;;  %v1039_v24 = vld [vmem:[%s1122_s2] ss:$0 sm:$0xff] (!%p170_p3) }
   0x9   : > { %816 = vmatprep.subr.bf16.mxu0 (!%p170_p3), %v903_v1  ;;  %863 = vmatprep.subr.bf16.mxu1 (!%p170_p3), %v903_v1 }
   0xc   : > { %817 = vmatpush3.bf16.msra.mxu0 (!%p170_p3), %v903_v1  ;;  %871 = vmatpush3.bf16.msra.mxu1 (!%p170_p3), %v903_v1 }
   0xd   : > { %818 = vmatprep.subr.bf16.mxu0 (!%p170_p3), %v904_v2  ;;  %864 = vmatprep.subr.bf16.mxu1 (!%p170_p3), %v904_v2 }
   0xe   : > { %s1129_s18 = smov (!%p204_p4, %s759_s18), 63 }
   0xf   : > { %s760_s23 = sshll.u32 %s1129_s18, 2  ;;  %s762_s12 = sshll.u32 %s1129_s18, 3 }
  0x10   : > { %s1003_s26 = scalar_lea.vmem %s1120_s0, %s760_s23  ;;  %819 = vmatpush3.bf16.msra.mxu0 %v904_v2  ;;  %872 = vmatpush3.bf16.msra.mxu1 %v904_v2  ;;  %s1047_s19 = scalar_lea.vmem %s1123_s3, %s762_s12 }
  0x11   : > { %v910_v4 = vld [vmem:[%s1003_s26] sm:$0xff]   ;;  %820 = vmatprep.subr.bf16.mxu0 %v905_v3  ;;  %865 = vmatprep.subr.bf16.mxu1 %v905_v3  ;;  %v912_v10 = vld [vmem:[%s1003_s26 + $0x8] sm:$0xff]   ;;  %v914_v12 = vld [vmem:[%s1003_s26 + $0x10] sm:$0xff]  }
  0x12   : > { %v911_v5 = vld [vmem:[%s1003_s26 + $0x40] sm:$0xff]   ;;  %830 = vmatprep.mubr.bf16.mxu0 %v910_v4  ;;  %v913_v11 = vld [vmem:[%s1003_s26 + $0x48] sm:$0xff]   ;;  %v915_v13 = vld [vmem:[%s1003_s26 + $0x50] sm:$0xff]  }
  0x13   : > { %846 = vmatprep.mubr.bf16.mxu1 %v911_v5  ;;  %v916_v14 = vld [vmem:[%s1003_s26 + $0x18] sm:$0xff]   ;;  %v918_v16 = vld [vmem:[%s1003_s26 + $0x20] sm:$0xff]   ;;  %v920_v18 = vld [vmem:[%s1003_s26 + $0x28] sm:$0xff]  }
  0x14   : > { %821 = vmatpush3.bf16.msra.mxu0 %v905_v3  ;;  %873 = vmatpush3.bf16.msra.mxu1 %v905_v3  ;;  %v917_v15 = vld [vmem:[%s1003_s26 + $0x58] sm:$0xff]   ;;  %v919_v17 = vld [vmem:[%s1003_s26 + $0x60] sm:$0xff]   ;;  %v921_v19 = vld [vmem:[%s1003_s26 + $0x68] sm:$0xff]  }
  0x15   : > { %822 = vmatprep.subr.bf16.mxu0 %v906_v6  ;;  %866 = vmatprep.subr.bf16.mxu1 %v906_v6  ;;  %v922_v20 = vld [vmem:[%s1003_s26 + $0x30] sm:$0xff]   ;;  %v924_v22 = vld [vmem:[%s1003_s26 + $0x38] sm:$0xff]  }
  0x16   : > { %v923_v21 = vld [vmem:[%s1003_s26 + $0x70] sm:$0xff]   ;;  %v925_v23 = vld [vmem:[%s1003_s26 + $0x78] sm:$0xff]  }
  0x18   : > { %823 = vmatpush3.bf16.msra.mxu0 %v906_v6  ;;  %874 = vmatpush3.bf16.msra.mxu1 %v906_v6 }
  0x19   : > { %824 = vmatprep.subr.bf16.mxu0 %v907_v7  ;;  %867 = vmatprep.subr.bf16.mxu1 %v907_v7 }
  0x1c   : > { %825 = vmatpush3.bf16.msra.mxu0 %v907_v7  ;;  %875 = vmatpush3.bf16.msra.mxu1 %v907_v7 }
  0x1d   : > { %826 = vmatprep.subr.bf16.mxu0 %v908_v8  ;;  %868 = vmatprep.subr.bf16.mxu1 %v908_v8 }
  0x20   : > { %827 = vmatpush3.bf16.msra.mxu0 %v908_v8  ;;  %876 = vmatpush3.bf16.msra.mxu1 %v908_v8 }
  0x21   : > { %828 = vmatprep.subr.bf16.mxu0 %v909_v9  ;;  %869 = vmatprep.subr.bf16.mxu1 %v909_v9 }
  0x24   : > { %829 = vmatpush3.bf16.msra.mxu0 %v909_v9  ;;  %877 = vmatpush3.bf16.msra.mxu1 %v909_v9 }
  0x27   : > { %831 = vmatmul.mubr.bf16.vlgmr.msra.gmra.mrb[0].mxu0 %v912_v10  ;;  %847 = vmatmul.mubr.bf16.vlgmr.msra.gmra.mrb[0].mxu1 %v913_v11 }
  0x28   : > { %834 = vmatprep.mubr.bf16.mxu0 %v914_v12  ;;  %850 = vmatprep.mubr.bf16.mxu1 %v915_v13 }
  0x2f   : > { %835 = vmatmul.mubr.bf16.gmra.mrb[4].mxu0 %v916_v14  ;;  %851 = vmatmul.mubr.bf16.gmra.mrb[4].mxu1 %v917_v15 }
  0x30   : > { %838 = vmatprep.mubr.bf16.mxu0 %v918_v16  ;;  %854 = vmatprep.mubr.bf16.mxu1 %v919_v17 }
  0x37   : > { %839 = vmatmul.mubr.bf16.gmra.mrb[8].mxu0 %v920_v18  ;;  %855 = vmatmul.mubr.bf16.gmra.mrb[8].mxu1 %v921_v19 }
  0x38   : > { %842 = vmatprep.mubr.bf16.mxu0 %v922_v20  ;;  %858 = vmatprep.mubr.bf16.mxu1 %v923_v21 }
  0x3f   : > { %843 = vmatmul.mubr.bf16.gmra.mrb[12].mxu0 %v924_v22  ;;  %859 = vmatmul.mubr.bf16.gmra.mrb[12].mxu1 %v925_v23 }
  0xfa   : > { %v832_v25 = vpop.f32.mrb[0].mxu0  ;;  %v848_v26 = vpop.f32.mrb[0].mxu1 }
  0xfb   : > { %v468_v27 = vadd.f32 %v832_v25, %v1039_v24  ;;  %v532_v28 = vadd.f32 %v848_v26, %v1039_v24  ;;  %v459_v29 = vpop.f32.mrb[1].mxu0  ;;  %v523_v30 = vpop.f32.mrb[1].mxu1 }
  0xfc   : > { %v460_v31 = vadd.f32 %v1039_v24, %v459_v29  ;;  %v524_v32 = vadd.f32 %v1039_v24, %v523_v30  ;;  %v833_v33 = vpop.f32.mrb[2].mxu0  ;;  %v849_v34 = vpop.f32.mrb[2].mxu1 }
  0xfd   : > { %v588_v35 = vmax.f32 %v468_v27, 0.0  ;;  %v604_v36 = vmax.f32 %v532_v28, 0.0  ;;  %v471_v37 = vadd.f32 %v833_v33, %v1039_v24  ;;  %v535_v38 = vadd.f32 %v849_v34, %v1039_v24  ;;  %v462_v39 = vpop.f32.mrb[3].mxu0  ;;  %v526_v40 = vpop.f32.mrb[3].mxu1 }
  0xfe   : > { %v586_v41 = vmax.f32 %v460_v31, 0.0  ;;  %v602_v42 = vmax.f32 %v524_v32, 0.0  ;;  %v463_v43 = vadd.f32 %v1039_v24, %v462_v39  ;;  %v527_v44 = vadd.f32 %v1039_v24, %v526_v40 }
  0xff   : > { %620 = vst [vmem:[%s1047_s19 + $0x10] sm:$0xff] %v588_v35  ;;  %636 = vst [vmem:[%s1047_s19 + $0x90] sm:$0xff] %v604_v36  ;;  %v589_v45 = vmax.f32 %v471_v37, 0.0  ;;  %v605_v46 = vmax.f32 %v535_v38, 0.0 }
 0x100   : > { %618 = vst [vmem:[%s1047_s19] sm:$0xff] %v586_v41  ;;  %634 = vst [vmem:[%s1047_s19 + $0x80] sm:$0xff] %v602_v42  ;;  %v587_v47 = vmax.f32 %v463_v43, 0.0  ;;  %v603_v48 = vmax.f32 %v527_v44, 0.0 }
 0x101   : > { %621 = vst [vmem:[%s1047_s19 + $0x18] sm:$0xff] %v589_v45  ;;  %637 = vst [vmem:[%s1047_s19 + $0x98] sm:$0xff] %v605_v46 }
 0x102   : > { %619 = vst [vmem:[%s1047_s19 + $0x8] sm:$0xff] %v587_v47  ;;  %635 = vst [vmem:[%s1047_s19 + $0x88] sm:$0xff] %v603_v48  ;;  %v836_v49 = vpop.f32.mrb[4].mxu0  ;;  %v852_v50 = vpop.f32.mrb[4].mxu1 }
 0x103   : > { %v484_v51 = vadd.f32 %v836_v49, %v1039_v24  ;;  %v548_v52 = vadd.f32 %v852_v50, %v1039_v24  ;;  %v475_v53 = vpop.f32.mrb[5].mxu0  ;;  %v539_v54 = vpop.f32.mrb[5].mxu1 }
 0x104   : > { %v476_v55 = vadd.f32 %v1039_v24, %v475_v53  ;;  %v540_v56 = vadd.f32 %v1039_v24, %v539_v54  ;;  %v837_v57 = vpop.f32.mrb[6].mxu0  ;;  %v853_v58 = vpop.f32.mrb[6].mxu1 }
 0x105   : > { %v592_v59 = vmax.f32 %v484_v51, 0.0  ;;  %v608_v60 = vmax.f32 %v548_v52, 0.0  ;;  %v487_v61 = vadd.f32 %v837_v57, %v1039_v24  ;;  %v551_v62 = vadd.f32 %v853_v58, %v1039_v24  ;;  %v478_v63 = vpop.f32.mrb[7].mxu0  ;;  %v542_v0 = vpop.f32.mrb[7].mxu1 }
 0x106   : > { %v590_v1 = vmax.f32 %v476_v55, 0.0  ;;  %v606_v2 = vmax.f32 %v540_v56, 0.0  ;;  %v479_v3 = vadd.f32 %v1039_v24, %v478_v63  ;;  %v543_v4 = vadd.f32 %v1039_v24, %v542_v0 }
 0x107   : > { %624 = vst [vmem:[%s1047_s19 + $0x30] sm:$0xff] %v592_v59  ;;  %640 = vst [vmem:[%s1047_s19 + $0xb0] sm:$0xff] %v608_v60  ;;  %v593_v5 = vmax.f32 %v487_v61, 0.0  ;;  %v609_v6 = vmax.f32 %v551_v62, 0.0 }
 0x108   : > { %622 = vst [vmem:[%s1047_s19 + $0x20] sm:$0xff] %v590_v1  ;;  %638 = vst [vmem:[%s1047_s19 + $0xa0] sm:$0xff] %v606_v2  ;;  %v591_v7 = vmax.f32 %v479_v3, 0.0  ;;  %v607_v8 = vmax.f32 %v543_v4, 0.0 }
 0x109   : > { %625 = vst [vmem:[%s1047_s19 + $0x38] sm:$0xff] %v593_v5  ;;  %641 = vst [vmem:[%s1047_s19 + $0xb8] sm:$0xff] %v609_v6 }
 0x10a   : > { %623 = vst [vmem:[%s1047_s19 + $0x28] sm:$0xff] %v591_v7  ;;  %639 = vst [vmem:[%s1047_s19 + $0xa8] sm:$0xff] %v607_v8  ;;  %v840_v9 = vpop.f32.mrb[8].mxu0  ;;  %v856_v10 = vpop.f32.mrb[8].mxu1 }
 0x10b   : > { %v500_v11 = vadd.f32 %v840_v9, %v1039_v24  ;;  %v564_v12 = vadd.f32 %v856_v10, %v1039_v24  ;;  %v491_v13 = vpop.f32.mrb[9].mxu0  ;;  %v555_v14 = vpop.f32.mrb[9].mxu1 }
 0x10c   : > { %v492_v15 = vadd.f32 %v1039_v24, %v491_v13  ;;  %v556_v16 = vadd.f32 %v1039_v24, %v555_v14  ;;  %v841_v17 = vpop.f32.mrb[10].mxu0  ;;  %v857_v18 = vpop.f32.mrb[10].mxu1 }
 0x10d   : > { %v596_v19 = vmax.f32 %v500_v11, 0.0  ;;  %v612_v20 = vmax.f32 %v564_v12, 0.0  ;;  %v503_v21 = vadd.f32 %v841_v17, %v1039_v24  ;;  %v567_v22 = vadd.f32 %v857_v18, %v1039_v24  ;;  %v494_v23 = vpop.f32.mrb[11].mxu0  ;;  %v558_v25 = vpop.f32.mrb[11].mxu1 }
 0x10e   : > { %v594_v26 = vmax.f32 %v492_v15, 0.0  ;;  %v610_v27 = vmax.f32 %v556_v16, 0.0  ;;  %v495_v28 = vadd.f32 %v1039_v24, %v494_v23  ;;  %v559_v29 = vadd.f32 %v1039_v24, %v558_v25 }
 0x10f   : > { %628 = vst [vmem:[%s1047_s19 + $0x50] sm:$0xff] %v596_v19  ;;  %644 = vst [vmem:[%s1047_s19 + $0xd0] sm:$0xff] %v612_v20  ;;  %v597_v30 = vmax.f32 %v503_v21, 0.0  ;;  %v613_v31 = vmax.f32 %v567_v22, 0.0 }
 0x110   : > { %626 = vst [vmem:[%s1047_s19 + $0x40] sm:$0xff] %v594_v26  ;;  %642 = vst [vmem:[%s1047_s19 + $0xc0] sm:$0xff] %v610_v27  ;;  %v595_v32 = vmax.f32 %v495_v28, 0.0  ;;  %v611_v33 = vmax.f32 %v559_v29, 0.0 }
 0x111   : > { %629 = vst [vmem:[%s1047_s19 + $0x58] sm:$0xff] %v597_v30  ;;  %645 = vst [vmem:[%s1047_s19 + $0xd8] sm:$0xff] %v613_v31 }
 0x112   : > { %627 = vst [vmem:[%s1047_s19 + $0x48] sm:$0xff] %v595_v32  ;;  %643 = vst [vmem:[%s1047_s19 + $0xc8] sm:$0xff] %v611_v33  ;;  %v844_v34 = vpop.f32.mrb[12].mxu0  ;;  %v860_v35 = vpop.f32.mrb[12].mxu1 }
 0x113   : > { %v516_v36 = vadd.f32 %v844_v34, %v1039_v24  ;;  %v580_v37 = vadd.f32 %v860_v35, %v1039_v24  ;;  %v507_v38 = vpop.f32.mrb[13].mxu0  ;;  %v571_v39 = vpop.f32.mrb[13].mxu1 }
 0x114   : > { %v508_v40 = vadd.f32 %v1039_v24, %v507_v38  ;;  %v572_v41 = vadd.f32 %v1039_v24, %v571_v39  ;;  %v845_v42 = vpop.f32.mrb[14].mxu0  ;;  %v861_v43 = vpop.f32.mrb[14].mxu1 }
 0x115   : > { %v600_v44 = vmax.f32 %v516_v36, 0.0  ;;  %v616_v45 = vmax.f32 %v580_v37, 0.0  ;;  %v519_v46 = vadd.f32 %v845_v42, %v1039_v24  ;;  %v583_v47 = vadd.f32 %v861_v43, %v1039_v24  ;;  %v510_v48 = vpop.f32.mrb[15].mxu0  ;;  %v574_v49 = vpop.f32.mrb[15].mxu1 }
 0x116   : > { %v598_v50 = vmax.f32 %v508_v40, 0.0  ;;  %v614_v51 = vmax.f32 %v572_v41, 0.0  ;;  %v511_v52 = vadd.f32 %v1039_v24, %v510_v48  ;;  %v575_v53 = vadd.f32 %v1039_v24, %v574_v49 }
 0x117   : > { %632 = vst [vmem:[%s1047_s19 + $0x70] sm:$0xff] %v600_v44  ;;  %648 = vst [vmem:[%s1047_s19 + $0xf0] sm:$0xff] %v616_v45  ;;  %v601_v54 = vmax.f32 %v519_v46, 0.0  ;;  %v617_v55 = vmax.f32 %v583_v47, 0.0 }
 0x118   : > { %630 = vst [vmem:[%s1047_s19 + $0x60] sm:$0xff] %v598_v50  ;;  %646 = vst [vmem:[%s1047_s19 + $0xe0] sm:$0xff] %v614_v51  ;;  %v599_v56 = vmax.f32 %v511_v52, 0.0  ;;  %v615_v57 = vmax.f32 %v575_v53, 0.0 }
 0x119   : > { %633 = vst [vmem:[%s1047_s19 + $0x78] sm:$0xff] %v601_v54  ;;  %649 = vst [vmem:[%s1047_s19 + $0xf8] sm:$0xff] %v617_v55 }
 0x11a   : > { %631 = vst [vmem:[%s1047_s19 + $0x68] sm:$0xff] %v599_v56  ;;  %647 = vst [vmem:[%s1047_s19 + $0xe8] sm:$0xff] %v615_v57 }
 0x11b PF: > { %s13_s14 = sadd.s32 1, %s948_s14   ;;  %s1124_s12 = smov %s944_s13 }
 0x11c   : > { %p10_p5 = scmp.ge.s32.totalorder %s13_s14, 4   ;;  %s1125_s13 = smov %s1127_s15 }
 0x11e   :  { %12 = sbr.rel (!%p10_p5) target bundleno = 2 (0x2), region = 68 }

</bundles_post_ra>
